<compile_context>
chip_gen: v6e
topology: v6e:2x2x1
jax: 0.10.0
libtpu: 0.0.40
codegen_flags: <defaults>
</compile_context>

<pallas_src>
import functools

import jax
import jax.numpy as jnp
from jax.experimental import pallas as pl
from jax.experimental.pallas import tpu as pltpu

EPS = 1e-5
H1, H2 = 128, 64


def _round_up(n, m):
    return ((n + m - 1) // m) * m


def _mlp_kernel(x_ref, w1_ref, b1_ref, w2_ref, b2_ref, w3_ref, b3_ref, o_ref):
    x = x_ref[...]

    # Linear(input, 128) + ReLU          (BN1 folded into w2/b2; f32 accum)
    h1 = jnp.dot(x, w1_ref[...], preferred_element_type=jnp.float32) + b1_ref[...]
    h1 = jnp.maximum(h1, 0.0)

    # Linear(128, 64) + ReLU             (BN2 folded into w3/b3)
    h1 = h1.astype(w2_ref.dtype)         # single-pass MXU when weights are bf16
    h2 = jnp.dot(h1, w2_ref[...], preferred_element_type=jnp.float32) + b2_ref[...]
    h2 = jnp.maximum(h2, 0.0)

    # Linear(64, 1): VPU multiply + lane reduce; w3 arrives as a [1, 64] f32
    # row and b3 as an SMEM scalar.
    out = jnp.sum(h2 * w3_ref[...], axis=-1, keepdims=True) + b3_ref[0]
    o_ref[...] = out.astype(o_ref.dtype)


def _fold_bn_into_linears(p):
    """Eval-mode BatchNorm is affine: y = s*h + t.  Fold into the next Linear."""
    s1 = p["g1"] * jax.lax.rsqrt(p["v1"] + EPS)          # [1, 128]
    t1 = p["be1"] - p["m1"] * s1                         # [1, 128]
    s2 = p["g2"] * jax.lax.rsqrt(p["v2"] + EPS)          # [1, 64]
    t2 = p["be2"] - p["m2"] * s2                         # [1, 64]

    w2f = s1.reshape(H1, 1) * p["w2"]                    # [128, 64]
    b2f = t1 @ p["w2"] + p["b2"]                         # [1, 64]
    w3f = (s2.reshape(H2, 1) * p["w3"]).reshape(1, H2)   # [1, 64]  (row vector)
    b3f = t2 @ p["w3"] + p["b3"]                         # [1, 1]
    return p["w1"], p["b1"], w2f, b2f, w3f, b3f


def _x_double_buffer_budget_bytes():
    """Budget for the streamed-x double buffer, scaled to the chip's VMEM."""
    try:
        vmem = pltpu.get_tpu_info().vmem_capacity_bytes
    except Exception:
        vmem = 64 << 20          # assume the smallest (v7x per-core) if unknown
    return int(min(max(vmem // 8, 8 << 20), 24 << 20))


@functools.partial(jax.jit, static_argnames=("use_bf16",))
def improved_mlp_forward(x, params, use_bf16=True):
    """x: [B, input_size] float32.  params: dict of arrays (see init_params)."""
    B, F = x.shape
    w1, b1, w2f, b2f, w3f, b3f = _fold_bn_into_linears(params)   # fold in f32

    cdt = jnp.bfloat16 if use_bf16 else jnp.float32
    cb = jnp.dtype(cdt).itemsize
    x_c = x.astype(cdt)                          # streamed operand (half HBM bytes)
    w1_c = w1.astype(cdt)                        # MXU operands in bf16, f32 accum
    w2_c = w2f.astype(cdt)
    b1_f = b1.astype(jnp.float32)                # biases / w3 stay f32 (VPU side)
    b2_f = b2f.astype(jnp.float32)
    w3_f = w3f.astype(jnp.float32)
    b3_s = b3f.reshape((1,)).astype(jnp.float32)  # -> SMEM scalar

    # ---- batch tile selection ------------------------------------------------
    # Big enough to amortize the ~0.35us/step grid overhead, small enough that
    # the double-buffered x tile stays inside the per-chip VMEM budget,
    # balanced so padding waste is < 16 rows, and >= 2 steps for mid/large
    # batches so v7x's two TensorCores both get work (megacore).
    budget = _x_double_buffer_budget_bytes()
    tb_cap = max(16, ((budget // max(2 * F * cb, 1)) // 16) * 16)
    tb_max = min(8192, tb_cap)
    b16 = _round_up(B, 16)
    n_steps = max(pl.cdiv(b16, tb_max), 1)
    if n_steps == 1 and b16 >= 256:
        n_steps = 2
    tb = _round_up(pl.cdiv(b16, n_steps), 16)
    grid = (pl.cdiv(B, tb),)
    b_out = grid[0] * tb            # output rows divisible by the tile (no masked
                                    # OOB output blocks); sliced back to B below.

    const = lambda i: (0, 0)        # weights: VMEM-resident via constant index map
    in_specs = [
        pl.BlockSpec((tb, F), lambda i: (i, 0)),   # x: streamed, partial last tile
        pl.BlockSpec((F, H1), const),
        pl.BlockSpec((1, H1), const),
        pl.BlockSpec((H1, H2), const),
        pl.BlockSpec((1, H2), const),
        pl.BlockSpec((1, H2), const),
        pl.BlockSpec(memory_space=pltpu.MemorySpace.SMEM),   # b3 scalar
    ]
    out_specs = pl.BlockSpec((tb, 1), lambda i: (i, 0))

    flops = 2 * B * (F * H1 + H1 * H2 + H2)
    bytes_accessed = (B * F * cb + (F * H1 + H1 * H2) * cb
                      + 4 * (H1 + 2 * H2 + 1) + 4 * b_out)
    cost = pl.CostEstimate(flops=int(flops), transcendentals=0,
                           bytes_accessed=int(bytes_accessed))

    vmem_bytes = (
        2 * tb * F * cb                      # double-buffered x tile
        + 2 * tb * 4                         # double-buffered out tile
        + 2 * (F * H1 + H1 * H2) * cb        # weights (Pallas double-buffers them)
        + 2 * (H1 + 2 * H2) * 4              # biases + w3 row
        + tb * (H1 + H2) * 4 + tb * H1 * cb  # live f32/bf16 intermediates
    )
    # Cap at 40 MiB so it also fits v7x's 64 MiB physical VMEM with headroom.
    vmem_limit = int(min(max(2 * vmem_bytes, 16 << 20), 40 << 20))

    out = pl.pallas_call(
        _mlp_kernel,
        out_shape=jax.ShapeDtypeStruct((b_out, 1), jnp.float32),
        grid=grid,
        in_specs=in_specs,
        out_specs=out_specs,
        compiler_params=pltpu.CompilerParams(
            dimension_semantics=("parallel",),
            vmem_limit_bytes=vmem_limit,
        ),
        cost_estimate=cost,
    )(x_c, w1_c, b1_f, w2_c, b2_f, w3_f, b3_s)

    return out[:B]


def init_params(key, input_size):
    """Deterministic synthetic parameters matching ImprovedMLP(__init__) shapes."""
    ks = jax.random.split(key, 12)
    f32 = jnp.float32

    def lin(kw, kb, fin, fout, scale):
        w = jax.random.normal(kw, (fin, fout), f32) * scale   # [F_in, F_out] (pre-transposed)
        b = jax.random.normal(kb, (1, fout), f32) * 0.01
        return w, b

    w1, b1 = lin(ks[0], ks[1], input_size, H1, 0.1)
    w2, b2 = lin(ks[2], ks[3], H1, H2, 0.1)
    w3, b3 = lin(ks[4], ks[5], H2, 1, 0.1)

    def bn(kg, kb, km, kv, f):
        g = 1.0 + 0.1 * jax.random.normal(kg, (1, f), f32)
        be = 0.1 * jax.random.normal(kb, (1, f), f32)
        m = 0.1 * jax.random.normal(km, (1, f), f32)
        v = 1.0 + 0.1 * jax.random.uniform(kv, (1, f), f32)   # strictly positive
        return g, be, m, v

    g1, be1, m1, v1 = bn(ks[6], ks[7], ks[8], ks[9], H1)
    g2, be2, m2, v2 = bn(ks[10], ks[11], ks[6], ks[7], H2)

    return dict(w1=w1, b1=b1, g1=g1, be1=be1, m1=m1, v1=v1,
                w2=w2, b2=b2, g2=g2, be2=be2, m2=m2, v2=v2,
                w3=w3, b3=b3)


def reference_forward(x, p):
    """Pure-JAX reference (eval-mode PyTorch semantics, BN kept explicit)."""
    h1 = jnp.maximum(x @ p["w1"] + p["b1"], 0.0)
    h1 = (h1 - p["m1"]) / jnp.sqrt(p["v1"] + EPS) * p["g1"] + p["be1"]
    h2 = jnp.maximum(h1 @ p["w2"] + p["b2"], 0.0)
    h2 = (h2 - p["m2"]) / jnp.sqrt(p["v2"] + EPS) * p["g2"] + p["be2"]
    return h2 @ p["w3"] + p["b3"]


if __name__ == "__main__":
    key = jax.random.PRNGKey(0)
    k_x, k_p = jax.random.split(key)

    batch = 8
    input_size = 32
    x = jax.random.normal(k_x, (batch, input_size), jnp.float32)
    params = init_params(k_p, input_size)
    ref = reference_forward(x, params)

    # Full-precision path: tight check against the f32 reference.
    out_f32 = jax.block_until_ready(improved_mlp_forward(x, params, use_bf16=False))
    assert out_f32.shape == (batch, 1), out_f32.shape
    assert jnp.allclose(out_f32, ref, atol=1e-4, rtol=1e-4), (out_f32, ref)

    # Default bf16 path: looser tolerance (bf16 operands, f32 accumulation).
    out_bf16 = jax.block_until_ready(improved_mlp_forward(x, params, use_bf16=True))
    assert out_bf16.shape == (batch, 1), out_bf16.shape
    assert jnp.allclose(out_bf16, ref, atol=5e-2, rtol=5e-2), (out_bf16, ref)

    # Larger, non-divisible batch: exercises the multi-step grid (>= 2 parallel
    # steps) and the partial last input tile.
    x2 = jax.random.normal(k_x, (300, input_size), jnp.float32)
    ref2 = reference_forward(x2, params)
    out2 = jax.block_until_ready(improved_mlp_forward(x2, params, use_bf16=True))
    assert out2.shape == (300, 1), out2.shape
    assert jnp.allclose(out2, ref2, atol=5e-2, rtol=5e-2), (out2, ref2)

    print("KERNEL_OK")
</pallas_src>

<mosaic_0001>
module attributes {stable_mosaic.version = 11 : i64} {
  func.func @_mlp_kernel(%arg0: i32, %arg1: memref<16x32xf32, #tpu.memory_space<vmem>>, %arg2: memref<32x128xf32, #tpu.memory_space<vmem>>, %arg3: memref<1x128xf32, #tpu.memory_space<vmem>>, %arg4: memref<128x64xf32, #tpu.memory_space<vmem>>, %arg5: memref<1x64xf32, #tpu.memory_space<vmem>>, %arg6: memref<1x64xf32, #tpu.memory_space<vmem>>, %arg7: memref<1xf32, #tpu.memory_space<smem>>, %arg8: memref<16x1xf32, #tpu.memory_space<vmem>>) attributes {dimension_semantics = [#tpu.dimension_semantics<parallel>], iteration_bounds = array<i64: 1>, scalar_prefetch = 0 : i64, scratch_operands = 0 : i64, tpu.core_type = #tpu.core_type<tc>, window_params = [{transform_indices = @transform_0, window_bounds = array<i64: 16, 32>}, {pipeline_mode = #tpu.pipeline_mode<synchronous>, transform_indices = @transform_1, window_bounds = array<i64: 32, 128>}, {pipeline_mode = #tpu.pipeline_mode<synchronous>, transform_indices = @transform_2, window_bounds = array<i64: 1, 128>}, {pipeline_mode = #tpu.pipeline_mode<synchronous>, transform_indices = @transform_3, window_bounds = array<i64: 128, 64>}, {pipeline_mode = #tpu.pipeline_mode<synchronous>, transform_indices = @transform_4, window_bounds = array<i64: 1, 64>}, {pipeline_mode = #tpu.pipeline_mode<synchronous>, transform_indices = @transform_5, window_bounds = array<i64: 1, 64>}, {transform_indices = @transform_6, window_bounds = array<i64: 1>}, {transform_indices = @transform_7, window_bounds = array<i64: 16, 1>}]} {
    %c0 = arith.constant 0 : index
    %c0_0 = arith.constant 0 : index
    %0 = vector.load %arg1[%c0, %c0_0] : memref<16x32xf32, #tpu.memory_space<vmem>>, vector<16x32xf32>
    %c0_1 = arith.constant 0 : index
    %c0_2 = arith.constant 0 : index
    %1 = vector.load %arg2[%c0_1, %c0_2] : memref<32x128xf32, #tpu.memory_space<vmem>>, vector<32x128xf32>
    %cst = arith.constant dense<0.000000e+00> : vector<16x128xf32>
    %2 = tpu.matmul %0, %1, %cst {dimension_numbers = #tpu.dot_dimension_numbers<[1], [0], [0], [1], [0, 0, 1, 1], [], []>} : vector<16x32xf32>, vector<32x128xf32>, vector<16x128xf32> -> vector<16x128xf32>
    %c0_3 = arith.constant 0 : index
    %c0_4 = arith.constant 0 : index
    %3 = vector.load %arg3[%c0_3, %c0_4] : memref<1x128xf32, #tpu.memory_space<vmem>>, vector<1x128xf32>
    %4 = vector.broadcast %3 : vector<1x128xf32> to vector<16x128xf32>
    %5 = arith.addf %2, %4 : vector<16x128xf32>
    %cst_5 = arith.constant 0.000000e+00 : f32
    %6 = vector.broadcast %cst_5 : f32 to vector<16x128xf32>
    %7 = arith.maximumf %5, %6 : vector<16x128xf32>
    %c0_6 = arith.constant 0 : index
    %c0_7 = arith.constant 0 : index
    %8 = vector.load %arg4[%c0_6, %c0_7] : memref<128x64xf32, #tpu.memory_space<vmem>>, vector<128x64xf32>
    %cst_8 = arith.constant dense<0.000000e+00> : vector<16x64xf32>
    %9 = tpu.matmul %7, %8, %cst_8 {dimension_numbers = #tpu.dot_dimension_numbers<[1], [0], [0], [1], [0, 0, 1, 1], [], []>} : vector<16x128xf32>, vector<128x64xf32>, vector<16x64xf32> -> vector<16x64xf32>
    %c0_9 = arith.constant 0 : index
    %c0_10 = arith.constant 0 : index
    %10 = vector.load %arg5[%c0_9, %c0_10] : memref<1x64xf32, #tpu.memory_space<vmem>>, vector<1x64xf32>
    %11 = vector.broadcast %10 : vector<1x64xf32> to vector<16x64xf32>
    %12 = arith.addf %9, %11 : vector<16x64xf32>
    %cst_11 = arith.constant 0.000000e+00 : f32
    %13 = vector.broadcast %cst_11 : f32 to vector<16x64xf32>
    %14 = arith.maximumf %12, %13 : vector<16x64xf32>
    %c0_12 = arith.constant 0 : index
    %c0_13 = arith.constant 0 : index
    %15 = vector.load %arg6[%c0_12, %c0_13] : memref<1x64xf32, #tpu.memory_space<vmem>>, vector<1x64xf32>
    %16 = vector.broadcast %15 : vector<1x64xf32> to vector<16x64xf32>
    %17 = arith.mulf %14, %16 : vector<16x64xf32>
    %cst_14 = arith.constant dense<0.000000e+00> : vector<16xf32>
    %18 = vector.multi_reduction <add>, %17, %cst_14 [1] : vector<16x64xf32> to vector<16xf32>
    %19 = vector.shape_cast %18 : vector<16xf32> to vector<16x1xf32>
    %c0_15 = arith.constant 0 : index
    %20 = memref.load %arg7[%c0_15] : memref<1xf32, #tpu.memory_space<smem>>
    %21 = vector.broadcast %20 : f32 to vector<16x1xf32>
    %22 = arith.addf %19, %21 : vector<16x1xf32>
    %c0_16 = arith.constant 0 : index
    %c0_17 = arith.constant 0 : index
    %23 = vector.load %arg8[%c0_16, %c0_17] : memref<16x1xf32, #tpu.memory_space<vmem>>, vector<16x1xf32>
    tpu.vector_store %arg8[%c0_16, %c0_17], %22 {strides = array<i32>} : memref<16x1xf32, #tpu.memory_space<vmem>>, vector<16x1xf32>,
    return
  }
  func.func @transform_0(%arg0: i32) -> (i32, i32) {
    %c0_i32 = arith.constant 0 : i32
    %c0_i32_0 = arith.constant 0 : i32
    return %arg0, %c0_i32 : i32, i32
  }
  func.func @transform_1(%arg0: i32) -> (i32, i32) {
    %c0_i32 = arith.constant 0 : i32
    %c0_i32_0 = arith.constant 0 : i32
    %c0_i32_1 = arith.constant 0 : i32
    return %c0_i32, %c0_i32_0 : i32, i32
  }
  func.func @transform_2(%arg0: i32) -> (i32, i32) {
    %c0_i32 = arith.constant 0 : i32
    %c0_i32_0 = arith.constant 0 : i32
    %c0_i32_1 = arith.constant 0 : i32
    return %c0_i32, %c0_i32_0 : i32, i32
  }
  func.func @transform_3(%arg0: i32) -> (i32, i32) {
    %c0_i32 = arith.constant 0 : i32
    %c0_i32_0 = arith.constant 0 : i32
    %c0_i32_1 = arith.constant 0 : i32
    return %c0_i32, %c0_i32_0 : i32, i32
  }
  func.func @transform_4(%arg0: i32) -> (i32, i32) {
    %c0_i32 = arith.constant 0 : i32
    %c0_i32_0 = arith.constant 0 : i32
    %c0_i32_1 = arith.constant 0 : i32
    return %c0_i32, %c0_i32_0 : i32, i32
  }
  func.func @transform_5(%arg0: i32) -> (i32, i32) {
    %c0_i32 = arith.constant 0 : i32
    %c0_i32_0 = arith.constant 0 : i32
    %c0_i32_1 = arith.constant 0 : i32
    return %c0_i32, %c0_i32_0 : i32, i32
  }
  func.func @transform_6(%arg0: i32) -> i32 {
    %c0_i32 = arith.constant 0 : i32
    %c0_i32_0 = arith.constant 0 : i32
    return %c0_i32 : i32
  }
  func.func @transform_7(%arg0: i32) -> (i32, i32) {
    %c0_i32 = arith.constant 0 : i32
    %c0_i32_0 = arith.constant 0 : i32
    return %arg0, %c0_i32 : i32, i32
  }
}

</mosaic_0001>

<bundles_post_ra>
// kernel: improved_mlp_forward.1
= control target key start
LH: loop header
LB: loop body
LE: loop exit
PB: predicated region body
PF: predicated region fallthrough
CT: control target
= control target key end

     0   :  { %vm40_vm0 = vcmask 261120   ;;  %vm233_vm1 = vcmask 523264   ;;  %vm244_vm2 = vcmask 7168   ;;  %s452_s1 = inlined_call_operand.vmem [shape: f32[32,128], index: 1, kind: input, shape index: {}]   ;;  %s453_s0 = inlined_call_operand.vmem [shape: f32[8,32], index: 0, kind: input, shape index: {}]   ;;  %s454_s3 = inlined_call_operand.vmem [shape: f32[128,64], index: 3, kind: input, shape index: {}]   ;;  %s455_s2 = inlined_call_operand.vmem [shape: f32[1,128], index: 2, kind: input, shape index: {}]   ;;  %s456_s4 = inlined_call_operand.vmem [shape: f32[1,64], index: 4, kind: input, shape index: {}]   ;;  %s457_s5 = inlined_call_operand.vmem [shape: f32[1,64], index: 5, kind: input, shape index: {}]   ;;  %s458_s6 = inlined_call_operand.<no memory space> [shape: f32[1], index: 6, kind: input, shape index: {}]   ;;  %s459_s7 = inlined_call_operand.vmem [shape: f32[16,1], index: 7, kind: output, shape index: {}]  }
   0x1   :  { %v32_v0 = vld [vmem:[%s452_s1 + $0x18] sm:$0xff]  ;;  %v31_v1 = vld [vmem:[%s452_s1 + $0x10] sm:$0xff]  ;;  %v27_v2 = vld [vmem:[%s453_s0] sm:$0xff]  ;;  %v241_v41 = vstv %s458_s6 }
   0x2   :  { %280 = vmatprep.subr.mxu0 %v32_v0  ;;  %v30_v3 = vld [vmem:[%s452_s1 + $0x8] sm:$0xff]  ;;  %288 = vmatprep.mubr.msk.f32.mxu0 %vm40_vm0, %v27_v2  ;;  %v139_v4 = vld [vmem:[%s454_s3 + $0x78] sm:$0xff]  ;;  %v138_v5 = vld [vmem:[%s454_s3 + $0x70] sm:$0xff] }
   0x3   :  { %281 = vmatpush3.msra.mxu0 %v32_v0  ;;  %291 = vmatprep.subr.mxu1 %v139_v4  ;;  %v29_v6 = vld [vmem:[%s452_s1] sm:$0xff]  ;;  %v137_v7 = vld [vmem:[%s454_s3 + $0x68] sm:$0xff]  ;;  %v135_v10 = vld [vmem:[%s454_s3 + $0x58] sm:$0xff] }
   0x4   :  { %282 = vmatprep.subr.mxu0 %v31_v1  ;;  %292 = vmatpush3.msra.mxu1 %v139_v4  ;;  %v28_v8 = vld [vmem:[%s453_s0 + $0x8] sm:$0xff]  ;;  %v136_v9 = vld [vmem:[%s454_s3 + $0x60] sm:$0xff]  ;;  %v134_v11 = vld [vmem:[%s454_s3 + $0x50] sm:$0xff] }
   0x5   :  { %283 = vmatpush3.msra.mxu0 %v31_v1  ;;  %293 = vmatprep.subr.mxu1 %v138_v5  ;;  %v133_v12 = vld [vmem:[%s454_s3 + $0x48] sm:$0xff]  ;;  %v132_v13 = vld [vmem:[%s454_s3 + $0x40] sm:$0xff]  ;;  %v131_v14 = vld [vmem:[%s454_s3 + $0x38] sm:$0xff] }
   0x6   :  { %284 = vmatprep.subr.mxu0 %v30_v3  ;;  %294 = vmatpush3.msra.mxu1 %v138_v5  ;;  %v130_v15 = vld [vmem:[%s454_s3 + $0x30] sm:$0xff]  ;;  %v129_v16 = vld [vmem:[%s454_s3 + $0x28] sm:$0xff]  ;;  %v128_v17 = vld [vmem:[%s454_s3 + $0x20] sm:$0xff] }
   0x7   :  { %285 = vmatpush3.msra.mxu0 %v30_v3  ;;  %295 = vmatprep.subr.mxu1 %v137_v7  ;;  %v127_v18 = vld [vmem:[%s454_s3 + $0x18] sm:$0xff]  ;;  %v126_v19 = vld [vmem:[%s454_s3 + $0x10] sm:$0xff]  ;;  %v125_v20 = vld [vmem:[%s454_s3 + $0x8] sm:$0xff] }
   0x8   :  { %286 = vmatprep.subr.mxu0 %v29_v6  ;;  %296 = vmatpush3.msra.mxu1 %v137_v7  ;;  %v124_v21 = vld [vmem:[%s454_s3] sm:$0xff] }
   0x9   :  { %287 = vmatpush3.msra.mxu0 %v29_v6  ;;  %297 = vmatprep.subr.mxu1 %v136_v9  ;;  %v251_v22 = vld [vmem:[%s455_s2] ss:$0 sm:$0xff] }
   0xa   :  { %289 = vmatmul.mubr.msk.f32.vlgmr.msra.gmra.mxu0 %vm40_vm0, %v28_v8  ;;  %298 = vmatpush3.msra.mxu1 %v136_v9  ;;  %v254_v29 = vld [vmem:[%s456_s4] ss:$0 sm:$0xff] }
   0xb   :  { %299 = vmatprep.subr.mxu1 %v135_v10  ;;  %v255_v36 = vld [vmem:[%s457_s5] ss:$0 sm:$0xff] }
   0xc   :  { %300 = vmatpush3.msra.mxu1 %v135_v10 }
   0xd   :  { %301 = vmatprep.subr.mxu1 %v134_v11 }
   0xe   :  { %302 = vmatpush3.msra.mxu1 %v134_v11 }
   0xf   :  { %303 = vmatprep.subr.mxu1 %v133_v12 }
  0x10   :  { %304 = vmatpush3.msra.mxu1 %v133_v12 }
  0x11   :  { %305 = vmatprep.subr.mxu1 %v132_v13 }
  0x12   :  { %306 = vmatpush3.msra.mxu1 %v132_v13 }
  0x13   :  { %307 = vmatprep.subr.mxu1 %v131_v14 }
  0x14   :  { %308 = vmatpush3.msra.mxu1 %v131_v14 }
  0x15   :  { %309 = vmatprep.subr.mxu1 %v130_v15 }
  0x16   :  { %310 = vmatpush3.msra.mxu1 %v130_v15 }
  0x17   :  { %311 = vmatprep.subr.mxu1 %v129_v16 }
  0x18   :  { %312 = vmatpush3.msra.mxu1 %v129_v16 }
  0x19   :  { %313 = vmatprep.subr.mxu1 %v128_v17 }
  0x1a   :  { %314 = vmatpush3.msra.mxu1 %v128_v17 }
  0x1b   :  { %315 = vmatprep.subr.mxu1 %v127_v18 }
  0x1c   :  { %316 = vmatpush3.msra.mxu1 %v127_v18 }
  0x1d   :  { %317 = vmatprep.subr.mxu1 %v126_v19 }
  0x1e   :  { %318 = vmatpush3.msra.mxu1 %v126_v19 }
  0x1f   :  { %319 = vmatprep.subr.mxu1 %v125_v20 }
  0x20   :  { %320 = vmatpush3.msra.mxu1 %v125_v20 }
  0x21   :  { %321 = vmatprep.subr.mxu1 %v124_v21 }
  0x22   :  { %322 = vmatpush3.msra.mxu1 %v124_v21 }
  0xca   :  { %v290_v23 = vpop.f32.mrf.mxu0 }
  0xcb   :  { %v119_v24 = vadd.f32 %v290_v23, %v251_v22 }
  0xcc   :  { %v113_v25 = vpop.f32.mrf.mxu0 }
  0xcd   :  { %v114_v26 = vadd.f32 %v251_v22, %v113_v25  ;;  %v123_v28 = vmax.f32 %v119_v24, 0.0 }
  0xcf   :  { %v122_v27 = vmax.f32 %v114_v26, 0.0 }
  0xd1   :  { %323 = vmatprep.mubr.f32.mxu1 %v122_v27 }
  0xd2   :  { %324 = vmatmul.mubr.f32.vlgmr.msra.gmra.mxu1 %v123_v28 }
 0x192   :  { %v325_v30 = vpop.f32.mrf.mxu1 }
 0x193   :  { %v219_v31 = vadd.f32 %v325_v30, %v254_v29 }
 0x194   :  { %v213_v32 = vpop.f32.mrf.mxu1 }
 0x195   :  { %v214_v33 = vadd.f32 %v254_v29, %v213_v32  ;;  %v223_v34 = vmax.f32 %v219_v31, 0.0 }
 0x197   :  { %v222_v35 = vmax.f32 %v214_v33, 0.0  ;;  %v232_v39 = vmul.f32 %v255_v36, %v223_v34 }
 0x199   :  { %v231_v37 = vmul.f32 %v255_v36, %v222_v35  ;;  %v237_v40 = vsel %vm233_vm1, %v232_v39, 0.0 }
 0x19b   :  { %v234_v38 = vsel %vm233_vm1, %v231_v37, 0.0 }
 0x19c   :  { %235 = vadd.xlane.f32.xlu0 %v234_v38 }
 0x1a0   :  { %238 = vadd.xlane.f32.xlu0 %v237_v40 }
 0x225   :  { %v236_v42 = vpop.xlane.xlu0 %235 }
 0x226   :  { %v242_v43 = vadd.f32 %v241_v41, %v236_v42 }
 0x228   :  { %245 = vst.msk [vmem:[%s459_s7] sm:$0xff] %vm244_vm2, %v242_v43 }
 0x229   :  { %v239_v44 = vpop.xlane.xlu0 %238 }
 0x22a   :  { %v243_v45 = vadd.f32 %v241_v41, %v239_v44 }
 0x22c   :  { %246 = vst.msk [vmem:[%s459_s7 + $0x8] sm:$0xff] %vm244_vm2, %v243_v45 }

</bundles_post_ra>
